<compile_context>
chip_gen: v7x
topology: tpu7x:2x2x1
jax: 0.10.0
libtpu: 0.0.40
codegen_flags: <defaults>
</compile_context>

<pallas_src>
import functools

import jax
import jax.numpy as jnp
from jax.experimental import pallas as pl
from jax.experimental.pallas import tpu as pltpu


# ----------------------------- glue (plain JAX) -----------------------------
def window_partition(x, ws):
    B, H, W, C = x.shape
    x = x.reshape(B, H // ws, ws, W // ws, ws, C)
    x = jnp.transpose(x, (0, 1, 3, 2, 4, 5))
    return x.reshape(-1, ws, ws, C)


def _linear_interp_matrix(dst, src):
    # PyTorch bilinear, align_corners=False: half-pixel centers, clamp at 0.
    scale = src / dst
    s = (jnp.arange(dst, dtype=jnp.float32) + 0.5) * scale - 0.5
    s = jnp.clip(s, 0.0)
    i0 = jnp.clip(jnp.floor(s).astype(jnp.int32), 0, src - 1)
    i1 = jnp.minimum(i0 + 1, src - 1)
    w1 = s - i0.astype(jnp.float32)
    w0 = 1.0 - w1
    return (w0[:, None] * jax.nn.one_hot(i0, src, dtype=jnp.float32)
            + w1[:, None] * jax.nn.one_hot(i1, src, dtype=jnp.float32))


# ------------------------------ Pallas kernel -------------------------------
def _fused_kernel(win_ref, bias_ref, sel_pool_ref, rep_c_ref, sel_tok_ref,
                  rep_t_ref, rep_w_ref, bmask_ref, a_exp_ref, out_ref,
                  *, scale_over_t):
    """One batch element per grid step; everything lane-dense / MXU-friendly.

    win_ref : (1, N, T*C)  window slab; row n = hrow*Ws+wcol, lane j = t*C+c
    bias_ref: (1, T)       bias row for the (single surviving) mean query
    sel_pool: (T*C, C)     kron(1_T,   I_C)  — sum over tokens
    rep_c   : (C, T*C)     kron(1_T^T, I_C)  — broadcast a (N,C) row over T
    sel_tok : (T*C, T)     kron(I_T,   1_C)  — sum over channels
    rep_t   : (T, T*C)     kron(I_T, 1_C^T)  — broadcast a (N,T) row over C
    rep_w   : (C, W*C)     kron(1_W^T, I_C)  — broadcast a (N,C) row over W
    bmask   : (N, W*C)     Bm[w, n%Ws]       — W-direction bilinear weights
    a_exp   : (H, N)       A[hh, n//Ws]      — H-direction bilinear weights
    out_ref : (1, H, W*C)  lane-dense output slab
    """
    s = win_ref[0]                                                        # (N, T*C)

    # mean-window query (attention scale folded in): q[n,c] = scale * mean_t win
    q = jnp.dot(s, sel_pool_ref[...],
                preferred_element_type=jnp.float32) * scale_over_t        # (N, C)
    # dots[n,t] = sum_c q[n,c] * win[n,t,c]  (broadcast q over T via MXU)
    q_rep = jnp.dot(q, rep_c_ref[...], preferred_element_type=jnp.float32)   # (N, T*C)
    dots = jnp.dot(q_rep * s, sel_tok_ref[...],
                   preferred_element_type=jnp.float32) + bias_ref[...]       # (N, T)

    # softmax over the T window tokens (exact divide — only T terms, ~free)
    m = jnp.max(dots, axis=-1, keepdims=True)
    e = jnp.exp(dots - m)
    attn = e / jnp.sum(e, axis=-1, keepdims=True)                            # (N, T)

    # pooled token 0:  out0[n,c] = sum_t attn[n,t] * win[n,t,c]
    attn_rep = jnp.dot(attn, rep_t_ref[...], preferred_element_type=jnp.float32)  # (N, T*C)
    out0 = jnp.dot(attn_rep * s, sel_pool_ref[...],
                   preferred_element_type=jnp.float32)                        # (N, C)

    # separable bilinear upsample (align_corners=False), kron(Bm^T, I_C)-free:
    #   out[hh, w*C+c] = sum_n A[hh, n//Ws] * Bm[w, n%Ws] * out0[n, c]
    z = jnp.dot(out0, rep_w_ref[...],
                preferred_element_type=jnp.float32) * bmask_ref[...]          # (N, W*C)
    out_ref[0] = jnp.dot(a_exp_ref[...], z, preferred_element_type=jnp.float32)  # (H, W*C)


# -------------------------------- wrapper ------------------------------------
def dr_lesion_attention(x, lesion_queries, rel_pos_bias, window_size):
    del lesion_queries  # only attention-output token 0 (mean query) is kept by
    #                     the module (`out[:, 0, :]`); softmax is per-query-row,
    #                     so the lesion-query rows never influence the result.
    B, H, W, C = x.shape
    ws = window_size
    T = ws * ws
    Hs, Ws = H // ws, W // ws
    N = Hs * Ws
    scale = C ** (-0.5)

    # Lane-dense window slab (B, N, T*C): row n = hrow*Ws+wcol, lane = t*C+c.
    xb = x.reshape(B, Hs, ws, Ws, ws, C)
    xb = jnp.transpose(xb, (0, 1, 3, 2, 4, 5))               # (B, Hs, Ws, ws, ws, C)
    win = xb.reshape(B, N, T * C).astype(jnp.float32)

    # TODO(synk): the original `dots += rel_pos_bias.unsqueeze(0)` adds a
    # ((2*ws-1)**2, num_heads) tensor to a (nw, 6, ws*ws) tensor, which does not
    # broadcast in PyTorch at the module's default hyper-parameters; we keep the
    # previously agreed semantic rel_pos_bias[:T, :6].T, of which only query
    # row 0 (the mean-token row) survives.
    bias0 = rel_pos_bias[:T, 0].astype(jnp.float32).reshape(1, T)

    # Constant selector / upsample matrices (grid-invariant -> DMA'd once).
    eye_c = jnp.eye(C, dtype=jnp.float32)
    eye_t = jnp.eye(T, dtype=jnp.float32)
    sel_pool = jnp.kron(jnp.ones((T, 1), jnp.float32), eye_c)    # (T*C, C)
    rep_c = jnp.kron(jnp.ones((1, T), jnp.float32), eye_c)       # (C, T*C)
    sel_tok = jnp.kron(eye_t, jnp.ones((C, 1), jnp.float32))     # (T*C, T)
    rep_t = jnp.kron(eye_t, jnp.ones((1, C), jnp.float32))       # (T, T*C)
    rep_w = jnp.kron(jnp.ones((1, W), jnp.float32), eye_c)       # (C, W*C)

    A = _linear_interp_matrix(H, Hs)                             # (H, Hs)
    Bm = _linear_interp_matrix(W, Ws)                            # (W, Ws)
    a_exp = jnp.repeat(A, Ws, axis=1)                            # (H, N):   A[hh, n//Ws]
    bmask = jnp.repeat(jnp.tile(Bm.T, (Hs, 1)), C, axis=1)       # (N, W*C): Bm[w, n%Ws]

    def const_spec(shape):
        # Grid-invariant input: constant block index -> DMA'd once.
        return pl.BlockSpec(shape, lambda b: (0,) * len(shape))

    # Advisory cost hint for the XLA scheduler.
    macs = B * (2 * N * (T * C) * C + N * C * (T * C) + N * (T * C) * T
                + N * T * (T * C) + N * C * (W * C) + H * N * (W * C))
    const_bytes = 4 * (T + 2 * T * C * C + 2 * T * C * T + C * W * C
                       + N * W * C + H * N)
    cost = pl.CostEstimate(
        flops=2 * macs,
        transcendentals=B * N * T,
        bytes_accessed=4 * (2 * B * H * W * C) + const_bytes,
    )

    out2d = pl.pallas_call(
        functools.partial(_fused_kernel, scale_over_t=scale / T),
        out_shape=jax.ShapeDtypeStruct((B, H, W * C), jnp.float32),
        grid=(B,),
        in_specs=[
            pl.BlockSpec((1, N, T * C), lambda b: (b, 0, 0)),
            const_spec((1, T)),
            const_spec((T * C, C)),
            const_spec((C, T * C)),
            const_spec((T * C, T)),
            const_spec((T, T * C)),
            const_spec((C, W * C)),
            const_spec((N, W * C)),
            const_spec((H, N)),
        ],
        out_specs=pl.BlockSpec((1, H, W * C), lambda b: (b, 0, 0)),
        compiler_params=pltpu.CompilerParams(
            dimension_semantics=("parallel",),
            vmem_limit_bytes=32 * 1024 * 1024),
        cost_estimate=cost,
    )(win, bias0, sel_pool, rep_c, sel_tok, rep_t, rep_w, bmask, a_exp)

    return out2d.reshape(B, H, W, C)


# ------------------------- pure-JAX reference check --------------------------
def reference(x, lesion_queries, rel_pos_bias, ws):
    B, H, W, C = x.shape
    T = ws * ws
    windows = window_partition(x, ws).reshape(-1, T, C)
    nw = windows.shape[0]
    lq = jnp.broadcast_to(lesion_queries.reshape(1, 5, C), (nw, 5, C))
    q = jnp.concatenate([windows.mean(axis=1, keepdims=True), lq], axis=1)
    dots = jnp.einsum('nqc,ntc->nqt', q, windows) * (C ** -0.5)
    dots = dots + rel_pos_bias[:T, :6].T[None]
    attn = jax.nn.softmax(dots, axis=-1)
    out = jnp.einsum('nqt,ntc->nqc', attn, windows)[:, 0, :]
    pooled = out.reshape(B, H // ws, W // ws, C)

    def up1d(arr, axis, dst):
        src = arr.shape[axis]
        sc = src / dst
        s = jnp.clip((jnp.arange(dst, dtype=jnp.float32) + 0.5) * sc - 0.5, 0.0)
        i0 = jnp.clip(jnp.floor(s).astype(jnp.int32), 0, src - 1)
        i1 = jnp.minimum(i0 + 1, src - 1)
        w1 = s - i0.astype(jnp.float32)
        shape = [1] * arr.ndim
        shape[axis] = dst
        w1 = w1.reshape(shape)
        return (jnp.take(arr, i0, axis=axis) * (1.0 - w1)
                + jnp.take(arr, i1, axis=axis) * w1)

    return up1d(up1d(pooled, 1, H), 2, W)


if __name__ == "__main__":
    key = jax.random.PRNGKey(0)
    k1, k2, k3 = jax.random.split(key, 3)
    B, H, W, C = 2, 16, 16, 32
    window_size, num_heads = 4, 6

    x = jax.random.normal(k1, (B, H, W, C), dtype=jnp.float32)
    lesion_queries = jax.random.normal(k2, (1, 5, C), dtype=jnp.float32)
    rel_pos_bias = jax.random.normal(
        k3, ((2 * window_size - 1) ** 2, num_heads), dtype=jnp.float32)

    out = dr_lesion_attention(x, lesion_queries, rel_pos_bias, window_size)
    out = jax.block_until_ready(out)

    ref = reference(x, lesion_queries, rel_pos_bias, window_size)
    assert out.shape == (B, H, W, C)
    # The approx reciprocal is gone (exact softmax divide); tolerance kept
    # conservative only for f32 MXU rounding across the chained matmuls.
    if not bool(jnp.allclose(out, ref, atol=2e-3, rtol=2e-3)):
        raise AssertionError("Pallas kernel output does not match reference")
    print("KERNEL_OK")
</pallas_src>

<mosaic_0001>
module attributes {stable_mosaic.version = 11 : i64} {
  func.func @_fused_kernel(%arg0: i32, %arg1: memref<1x16x512xf32, #tpu.memory_space<vmem>>, %arg2: memref<1x16xf32, #tpu.memory_space<vmem>>, %arg3: memref<512x32xf32, #tpu.memory_space<vmem>>, %arg4: memref<32x512xf32, #tpu.memory_space<vmem>>, %arg5: memref<512x16xf32, #tpu.memory_space<vmem>>, %arg6: memref<16x512xf32, #tpu.memory_space<vmem>>, %arg7: memref<32x512xf32, #tpu.memory_space<vmem>>, %arg8: memref<16x512xf32, #tpu.memory_space<vmem>>, %arg9: memref<16x16xf32, #tpu.memory_space<vmem>>, %arg10: memref<1x16x512xf32, #tpu.memory_space<vmem>>) attributes {dimension_semantics = [#tpu.dimension_semantics<parallel>], iteration_bounds = array<i64: 2>, scalar_prefetch = 0 : i64, scratch_operands = 0 : i64, tpu.core_type = #tpu.core_type<tc>, window_params = [{transform_indices = @transform_0, window_bounds = array<i64: 1, 16, 512>}, {pipeline_mode = #tpu.pipeline_mode<synchronous>, transform_indices = @transform_1, window_bounds = array<i64: 1, 16>}, {pipeline_mode = #tpu.pipeline_mode<synchronous>, transform_indices = @transform_2, window_bounds = array<i64: 512, 32>}, {pipeline_mode = #tpu.pipeline_mode<synchronous>, transform_indices = @transform_3, window_bounds = array<i64: 32, 512>}, {pipeline_mode = #tpu.pipeline_mode<synchronous>, transform_indices = @transform_4, window_bounds = array<i64: 512, 16>}, {pipeline_mode = #tpu.pipeline_mode<synchronous>, transform_indices = @transform_5, window_bounds = array<i64: 16, 512>}, {pipeline_mode = #tpu.pipeline_mode<synchronous>, transform_indices = @transform_6, window_bounds = array<i64: 32, 512>}, {pipeline_mode = #tpu.pipeline_mode<synchronous>, transform_indices = @transform_7, window_bounds = array<i64: 16, 512>}, {pipeline_mode = #tpu.pipeline_mode<synchronous>, transform_indices = @transform_8, window_bounds = array<i64: 16, 16>}, {transform_indices = @transform_9, window_bounds = array<i64: 1, 16, 512>}]} {
    %c0 = arith.constant 0 : index
    %c0_0 = arith.constant 0 : index
    %c0_1 = arith.constant 0 : index
    %0 = vector.load %arg1[%c0, %c0_0, %c0_1] : memref<1x16x512xf32, #tpu.memory_space<vmem>>, vector<1x16x512xf32>
    %1 = vector.shape_cast %0 : vector<1x16x512xf32> to vector<16x512xf32>
    %c0_2 = arith.constant 0 : index
    %c0_3 = arith.constant 0 : index
    %2 = vector.load %arg3[%c0_2, %c0_3] : memref<512x32xf32, #tpu.memory_space<vmem>>, vector<512x32xf32>
    %cst = arith.constant dense<0.000000e+00> : vector<16x32xf32>
    %3 = tpu.matmul %1, %2, %cst {dimension_numbers = #tpu.dot_dimension_numbers<[1], [0], [0], [1], [0, 0, 1, 1], [], []>} : vector<16x512xf32>, vector<512x32xf32>, vector<16x32xf32> -> vector<16x32xf32>
    %cst_4 = arith.constant 0.0110485433 : f32
    %4 = vector.broadcast %cst_4 : f32 to vector<16x32xf32>
    %5 = arith.mulf %3, %4 : vector<16x32xf32>
    %c0_5 = arith.constant 0 : index
    %c0_6 = arith.constant 0 : index
    %6 = vector.load %arg4[%c0_5, %c0_6] : memref<32x512xf32, #tpu.memory_space<vmem>>, vector<32x512xf32>
    %cst_7 = arith.constant dense<0.000000e+00> : vector<16x512xf32>
    %7 = tpu.matmul %5, %6, %cst_7 {dimension_numbers = #tpu.dot_dimension_numbers<[1], [0], [0], [1], [0, 0, 1, 1], [], []>} : vector<16x32xf32>, vector<32x512xf32>, vector<16x512xf32> -> vector<16x512xf32>
    %8 = arith.mulf %7, %1 : vector<16x512xf32>
    %c0_8 = arith.constant 0 : index
    %c0_9 = arith.constant 0 : index
    %9 = vector.load %arg5[%c0_8, %c0_9] : memref<512x16xf32, #tpu.memory_space<vmem>>, vector<512x16xf32>
    %cst_10 = arith.constant dense<0.000000e+00> : vector<16x16xf32>
    %10 = tpu.matmul %8, %9, %cst_10 {dimension_numbers = #tpu.dot_dimension_numbers<[1], [0], [0], [1], [0, 0, 1, 1], [], []>} : vector<16x512xf32>, vector<512x16xf32>, vector<16x16xf32> -> vector<16x16xf32>
    %c0_11 = arith.constant 0 : index
    %c0_12 = arith.constant 0 : index
    %11 = vector.load %arg2[%c0_11, %c0_12] : memref<1x16xf32, #tpu.memory_space<vmem>>, vector<1x16xf32>
    %12 = vector.broadcast %11 : vector<1x16xf32> to vector<16x16xf32>
    %13 = arith.addf %10, %12 : vector<16x16xf32>
    %cst_13 = arith.constant dense<0xFF800000> : vector<16xf32>
    %14 = vector.multi_reduction <maximumf>, %13, %cst_13 [1] : vector<16x16xf32> to vector<16xf32>
    %15 = vector.shape_cast %14 : vector<16xf32> to vector<16x1xf32>
    %16 = vector.broadcast %15 : vector<16x1xf32> to vector<16x16xf32>
    %17 = arith.subf %13, %16 : vector<16x16xf32>
    %18 = math.exp %17 : vector<16x16xf32>
    %cst_14 = arith.constant dense<0.000000e+00> : vector<16xf32>
    %19 = vector.multi_reduction <add>, %18, %cst_14 [1] : vector<16x16xf32> to vector<16xf32>
    %20 = vector.shape_cast %19 : vector<16xf32> to vector<16x1xf32>
    %21 = vector.broadcast %20 : vector<16x1xf32> to vector<16x16xf32>
    %22 = arith.divf %18, %21 : vector<16x16xf32>
    %c0_15 = arith.constant 0 : index
    %c0_16 = arith.constant 0 : index
    %23 = vector.load %arg6[%c0_15, %c0_16] : memref<16x512xf32, #tpu.memory_space<vmem>>, vector<16x512xf32>
    %cst_17 = arith.constant dense<0.000000e+00> : vector<16x512xf32>
    %24 = tpu.matmul %22, %23, %cst_17 {dimension_numbers = #tpu.dot_dimension_numbers<[1], [0], [0], [1], [0, 0, 1, 1], [], []>} : vector<16x16xf32>, vector<16x512xf32>, vector<16x512xf32> -> vector<16x512xf32>
    %25 = arith.mulf %24, %1 : vector<16x512xf32>
    %c0_18 = arith.constant 0 : index
    %c0_19 = arith.constant 0 : index
    %26 = vector.load %arg3[%c0_18, %c0_19] : memref<512x32xf32, #tpu.memory_space<vmem>>, vector<512x32xf32>
    %cst_20 = arith.constant dense<0.000000e+00> : vector<16x32xf32>
    %27 = tpu.matmul %25, %26, %cst_20 {dimension_numbers = #tpu.dot_dimension_numbers<[1], [0], [0], [1], [0, 0, 1, 1], [], []>} : vector<16x512xf32>, vector<512x32xf32>, vector<16x32xf32> -> vector<16x32xf32>
    %c0_21 = arith.constant 0 : index
    %c0_22 = arith.constant 0 : index
    %28 = vector.load %arg7[%c0_21, %c0_22] : memref<32x512xf32, #tpu.memory_space<vmem>>, vector<32x512xf32>
    %cst_23 = arith.constant dense<0.000000e+00> : vector<16x512xf32>
    %29 = tpu.matmul %27, %28, %cst_23 {dimension_numbers = #tpu.dot_dimension_numbers<[1], [0], [0], [1], [0, 0, 1, 1], [], []>} : vector<16x32xf32>, vector<32x512xf32>, vector<16x512xf32> -> vector<16x512xf32>
    %c0_24 = arith.constant 0 : index
    %c0_25 = arith.constant 0 : index
    %30 = vector.load %arg8[%c0_24, %c0_25] : memref<16x512xf32, #tpu.memory_space<vmem>>, vector<16x512xf32>
    %31 = arith.mulf %29, %30 : vector<16x512xf32>
    %c0_26 = arith.constant 0 : index
    %c0_27 = arith.constant 0 : index
    %32 = vector.load %arg9[%c0_26, %c0_27] : memref<16x16xf32, #tpu.memory_space<vmem>>, vector<16x16xf32>
    %cst_28 = arith.constant dense<0.000000e+00> : vector<16x512xf32>
    %33 = tpu.matmul %32, %31, %cst_28 {dimension_numbers = #tpu.dot_dimension_numbers<[1], [0], [0], [1], [0, 0, 1, 1], [], []>} : vector<16x16xf32>, vector<16x512xf32>, vector<16x512xf32> -> vector<16x512xf32>
    %c0_29 = arith.constant 0 : index
    %c0_30 = arith.constant 0 : index
    %c0_31 = arith.constant 0 : index
    %34 = vector.load %arg10[%c0_29, %c0_30, %c0_31] : memref<1x16x512xf32, #tpu.memory_space<vmem>>, vector<1x16x512xf32>
    %35 = vector.shape_cast %34 : vector<1x16x512xf32> to vector<16x512xf32>
    %36 = vector.shape_cast %33 : vector<16x512xf32> to vector<1x16x512xf32>
    tpu.vector_store %arg10[%c0_29, %c0_30, %c0_31], %36 {strides = array<i32>} : memref<1x16x512xf32, #tpu.memory_space<vmem>>, vector<1x16x512xf32>,
    return
  }
  func.func @transform_0(%arg0: i32) -> (i32, i32, i32) {
    %c0_i32 = arith.constant 0 : i32
    %c0_i32_0 = arith.constant 0 : i32
    %c0_i32_1 = arith.constant 0 : i32
    return %arg0, %c0_i32, %c0_i32_0 : i32, i32, i32
  }
  func.func @transform_1(%arg0: i32) -> (i32, i32) {
    %c0_i32 = arith.constant 0 : i32
    %c0_i32_0 = arith.constant 0 : i32
    %c0_i32_1 = arith.constant 0 : i32
    return %c0_i32, %c0_i32_0 : i32, i32
  }
  func.func @transform_2(%arg0: i32) -> (i32, i32) {
    %c0_i32 = arith.constant 0 : i32
    %c0_i32_0 = arith.constant 0 : i32
    %c0_i32_1 = arith.constant 0 : i32
    return %c0_i32, %c0_i32_0 : i32, i32
  }
  func.func @transform_3(%arg0: i32) -> (i32, i32) {
    %c0_i32 = arith.constant 0 : i32
    %c0_i32_0 = arith.constant 0 : i32
    %c0_i32_1 = arith.constant 0 : i32
    return %c0_i32, %c0_i32_0 : i32, i32
  }
  func.func @transform_4(%arg0: i32) -> (i32, i32) {
    %c0_i32 = arith.constant 0 : i32
    %c0_i32_0 = arith.constant 0 : i32
    %c0_i32_1 = arith.constant 0 : i32
    return %c0_i32, %c0_i32_0 : i32, i32
  }
  func.func @transform_5(%arg0: i32) -> (i32, i32) {
    %c0_i32 = arith.constant 0 : i32
    %c0_i32_0 = arith.constant 0 : i32
    %c0_i32_1 = arith.constant 0 : i32
    return %c0_i32, %c0_i32_0 : i32, i32
  }
  func.func @transform_6(%arg0: i32) -> (i32, i32) {
    %c0_i32 = arith.constant 0 : i32
    %c0_i32_0 = arith.constant 0 : i32
    %c0_i32_1 = arith.constant 0 : i32
    return %c0_i32, %c0_i32_0 : i32, i32
  }
  func.func @transform_7(%arg0: i32) -> (i32, i32) {
    %c0_i32 = arith.constant 0 : i32
    %c0_i32_0 = arith.constant 0 : i32
    %c0_i32_1 = arith.constant 0 : i32
    return %c0_i32, %c0_i32_0 : i32, i32
  }
  func.func @transform_8(%arg0: i32) -> (i32, i32) {
    %c0_i32 = arith.constant 0 : i32
    %c0_i32_0 = arith.constant 0 : i32
    %c0_i32_1 = arith.constant 0 : i32
    return %c0_i32, %c0_i32_0 : i32, i32
  }
  func.func @transform_9(%arg0: i32) -> (i32, i32, i32) {
    %c0_i32 = arith.constant 0 : i32
    %c0_i32_0 = arith.constant 0 : i32
    %c0_i32_1 = arith.constant 0 : i32
    return %arg0, %c0_i32, %c0_i32_0 : i32, i32, i32
  }
}

</mosaic_0001>

<bundles_post_ra>
// kernel: tpu_custom_call.1
= control target key start
LH: loop header
LB: loop body
LE: loop exit
PB: predicated region body
PF: predicated region fallthrough
CT: control target
= control target key end

     0   :  { %14 = vsyncpa [#allocation3], 0  ;;  %s3274_s0 = inlined_call_operand.vmem [shape: f32[2,16,512], index: 0, kind: input, shape index: {}]   ;;  %s3275_s1 = inlined_call_operand.vmem [shape: f32[1,16], index: 1, kind: input, shape index: {}]   ;;  %s3276_s2 = inlined_call_operand.vmem [shape: f32[512,32], index: 2, kind: input, shape index: {}]   ;;  %s3277_s3 = inlined_call_operand.vmem [shape: f32[32,512], index: 3, kind: input, shape index: {}]   ;;  %s3278_s4 = inlined_call_operand.vmem [shape: f32[512,16], index: 4, kind: input, shape index: {}]   ;;  %s3279_s5 = inlined_call_operand.vmem [shape: f32[16,512], index: 5, kind: input, shape index: {}]   ;;  %s3280_s6 = inlined_call_operand.vmem [shape: f32[32,512], index: 6, kind: input, shape index: {}]   ;;  %s3281_s7 = inlined_call_operand.vmem [shape: f32[16,512], index: 7, kind: input, shape index: {}]   ;;  %s3282_s8 = inlined_call_operand.vmem [shape: f32[16,16], index: 8, kind: input, shape index: {}]   ;;  %s3283_s9 = inlined_call_operand.hbm [shape: f32[2,16,512], index: 9, kind: output, shape index: {}]  }
   0x1   :  { %16 = vsyncpa [#allocation3 + $0x1], 0  ;;  %s2415_s30 = smov 0   ;;  %s2417_s10 = smov 0  }
   0x2   :  { %s2419_s11 = smov 0   ;;  %s2421_s12 = smov 0  }
   0x3 LB: > { %s2436_s13 = sadd.s32 4294967295, %s2359_s12   ;;  %s1748_s14 = sadd.s32 4294967294, %s2359_s12   ;;  %s2359_s12 = sphi %s2421_s12, %s3289_s12   ;;  %s2355_s11 = sphi %s2419_s11, %s3288_s11   ;;  %s2351_s10 = sphi %s2417_s10, %s3287_s10   ;;  %s2347_s30 = sphi %s2415_s30, %s3286_s30  }
   0x4   : > { %s2440_s15 = sadd.s32 1, %s2359_s12   ;;  %s223_s16 = sadd.s32 1, %s2355_s11 }
   0x5   : > { %s220_s17 = ssub.s32 %s2359_s12, %s2440_s15  ;;  %p233_p0 = scmp.ne.s32.totalorder %s2355_s11, %s2351_s10 }
   0x6   : > { %p221_p1 = scmp.eq.s32.totalorder %s220_s17, 0  ;;  %p234_p2 = scmp.eq.s32.totalorder %s2436_s13, 1 }
   0x7   : > { %p239_p3 = scmp.ne.s32.totalorder %s2351_s10, %s2347_s30  ;;  %p240_p4 = scmp.eq.s32.totalorder %s1748_s14, 1 }
   0x8   : > { %s2451_s18 = scalar_select %p221_p1, %s2355_s11, %s223_s16  }
   0x9   : > { %p2453_p5 = por %p234_p2, %p233_p0  ;;  %p2457_p6 = por %p240_p4, %p239_p3 }
   0xa   : > { %p1751_p7 = scmp.ge.s32.totalorder %s2359_s12, 1  ;;  %p290_p8 = scmp.lt.s32.totalorder %s2359_s12, 3 }
   0xc   : > { %p291_p9 = pnand %p1751_p7, %p290_p8 }
   0xd   : > { %v355_v0 = vld [vmem:[%s3276_s2 + $0x80] sm:$0xff] (!%p291_p9)  ;;  %v356_v1 = vld [vmem:[%s3276_s2 + $0x88] sm:$0xff] (!%p291_p9)  ;;  %v357_v11 = vld [vmem:[%s3276_s2 + $0x90] sm:$0xff] (!%p291_p9)  ;;  %p326_p10 = scmp.lt.s32.totalorder (!%p291_p9), %s2436_s13, 1  ;;  %vm571_vm0 = vcmask (!%p291_p9), 261120   ;;  %vm961_vm1 = vcmask (!%p291_p9), 130048  }
   0xe   : > { %294 = sbr.rel (%p291_p9) target bundleno = 1908 (0x774), region = 56  ;;  %v387_v2 = vld [vmem:[%s3276_s2 + $0x180] sm:$0xff] (!%p291_p9)  ;;  %v2472_v3 = vpack.c.bf16 (!%p291_p9), %v356_v1, %v355_v0  ;;  %v388_v4 = vld [vmem:[%s3276_s2 + $0x188] sm:$0xff] (!%p291_p9)  ;;  %v358_v13 = vld [vmem:[%s3276_s2 + $0x98] sm:$0xff] (!%p291_p9)  ;;  %s323_s28 = sand.u32 (!%p291_p9), 1, %s2351_s10  }
   0xf   : > { %v339_v5 = vld [vmem:[%s3276_s2] sm:$0xff] (!%p291_p9)  ;;  %v340_v6 = vld [vmem:[%s3276_s2 + $0x8] sm:$0xff] (!%p291_p9)  ;;  %v2483_v7 = vpack.c.bf16 (!%p291_p9), %v388_v4, %v387_v2  ;;  %v389_v14 = vld [vmem:[%s3276_s2 + $0x190] sm:$0xff] (!%p291_p9)  ;;  %v2510_v16 = vpack.c.bf16 (!%p291_p9), %v358_v13, %v357_v11  ;;  %s1752_s29 = sshll.u32 (!%p291_p9), %s323_s28, 6  ;;  %s1778_s17 = sshll.u32 (!%p291_p9), %s2436_s13, 10 }
  0x10   : > { %v2485_v8 = vpack.c.bf16 (!%p291_p9), %v340_v6, %v339_v5  ;;  %v371_v9 = vld [vmem:[%s3276_s2 + $0x100] sm:$0xff] (!%p291_p9)  ;;  %v372_v10 = vld [vmem:[%s3276_s2 + $0x108] sm:$0xff] (!%p291_p9)  ;;  %2008 = vmatprep.subr.bf16.mxu0 (!%p291_p9), %v2472_v3  ;;  %v390_v15 = vld [vmem:[%s3276_s2 + $0x198] sm:$0xff] (!%p291_p9)  ;;  %s325_s14 = scalar_lea.vmem (!%p291_p9), [#allocation2], %s1752_s29  ;;  %s3231_s23 = scalar_lea.hbm (!%p291_p9), %s3283_s9, %s1778_s17 }
  0x11   : > { %v2497_v12 = vpack.c.bf16 (!%p291_p9), %v372_v10, %v371_v9  ;;  %2040 = vmatprep.subr.bf16.mxu1 (!%p291_p9), %v2483_v7  ;;  %v2512_v17 = vpack.c.bf16 (!%p291_p9), %v390_v15, %v389_v14  ;;  %v341_v18 = vld [vmem:[%s3276_s2 + $0x10] sm:$0xff] (!%p291_p9)  ;;  %v342_v19 = vld [vmem:[%s3276_s2 + $0x18] sm:$0xff] (!%p291_p9)  ;;  %v359_v23 = vld [vmem:[%s3276_s2 + $0xa0] sm:$0xff] (!%p291_p9)  ;;  %s2362_s25 = smov (!%p291_p9), [#allocation2]  }
  0x12   : > { %2010 = vmatpush3.bf16.msra.mxu0 (!%p291_p9), %v2485_v8  ;;  %v373_v20 = vld [vmem:[%s3276_s2 + $0x110] sm:$0xff] (!%p291_p9)  ;;  %v2524_v21 = vpack.c.bf16 (!%p291_p9), %v342_v19, %v341_v18  ;;  %v374_v22 = vld [vmem:[%s3276_s2 + $0x118] sm:$0xff] (!%p291_p9)  ;;  %v360_v24 = vld [vmem:[%s3276_s2 + $0xa8] sm:$0xff] (!%p291_p9) }
  0x13   : > { %2042 = vmatpush3.bf16.msra.mxu1 (!%p291_p9), %v2497_v12  ;;  %2012 = vmatprep.subr.bf16.mxu0 (!%p291_p9), %v2510_v16  ;;  %v2537_v25 = vpack.c.bf16 (!%p291_p9), %v374_v22, %v373_v20  ;;  %v2539_v26 = vpack.c.bf16 (!%p291_p9), %v360_v24, %v359_v23  ;;  %v391_v27 = vld [vmem:[%s3276_s2 + $0x1a0] sm:$0xff] (!%p291_p9)  ;;  %v392_v28 = vld [vmem:[%s3276_s2 + $0x1a8] sm:$0xff] (!%p291_p9)  ;;  %v361_v35 = vld [vmem:[%s3276_s2 + $0xb0] sm:$0xff] (!%p291_p9) }
  0x14   : > { %2044 = vmatprep.subr.bf16.mxu1 (!%p291_p9), %v2512_v17  ;;  %v343_v29 = vld [vmem:[%s3276_s2 + $0x20] sm:$0xff] (!%p291_p9)  ;;  %v2550_v30 = vpack.c.bf16 (!%p291_p9), %v392_v28, %v391_v27  ;;  %v344_v31 = vld [vmem:[%s3276_s2 + $0x28] sm:$0xff] (!%p291_p9)  ;;  %v362_v36 = vld [vmem:[%s3276_s2 + $0xb8] sm:$0xff] (!%p291_p9) }
  0x15   : > { %v375_v32 = vld [vmem:[%s3276_s2 + $0x120] sm:$0xff]  ;;  %v376_v33 = vld [vmem:[%s3276_s2 + $0x128] sm:$0xff]  ;;  %v2563_v34 = vpack.c.bf16 %v344_v31, %v343_v29  ;;  %v393_v37 = vld [vmem:[%s3276_s2 + $0x1b0] sm:$0xff]  ;;  %v2578_v39 = vpack.c.bf16 %v362_v36, %v361_v35  ;;  %s2613_s21 = scalar_select %p326_p10, %s2436_s13, 1 }
  0x16   : > { %2014 = vmatpush3.bf16.msra.mxu0 %v2524_v21  ;;  %v2576_v38 = vpack.c.bf16 %v376_v33, %v375_v32  ;;  %v394_v40 = vld [vmem:[%s3276_s2 + $0x1b8] sm:$0xff]  ;;  %v345_v41 = vld [vmem:[%s3276_s2 + $0x30] sm:$0xff]  ;;  %v363_v46 = vld [vmem:[%s3276_s2 + $0xc0] sm:$0xff]  ;;  %s3233_s13 = scalar_lea.sflag [#allocation3], %s323_s28 }
  0x17   : > { %2046 = vmatpush3.bf16.msra.mxu1 %v2537_v25  ;;  %2016 = vmatprep.subr.bf16.mxu0 %v2539_v26  ;;  %v346_v42 = vld [vmem:[%s3276_s2 + $0x38] sm:$0xff]  ;;  %v2590_v43 = vpack.c.bf16 %v394_v40, %v393_v37  ;;  %v377_v44 = vld [vmem:[%s3276_s2 + $0x130] sm:$0xff]  ;;  %v364_v47 = vld [vmem:[%s3276_s2 + $0xc8] sm:$0xff]  ;;  %s1777_s27 = sshll.u32 %s2613_s21, 6  ;;  %s1686_s21 = sshll.u32 %s325_s14, 4  ;;  %s3226_s21 = int_to_ptr.vmem [resolvable:$true] %s1686_s21 }
  0x18   : > { %2048 = vmatprep.subr.bf16.mxu1 %v2550_v30  ;;  %v378_v45 = vld [vmem:[%s3276_s2 + $0x138] sm:$0xff]  ;;  %v395_v48 = vld [vmem:[%s3276_s2 + $0x1c0] sm:$0xff]  ;;  %v396_v49 = vld [vmem:[%s3276_s2 + $0x1c8] sm:$0xff]  ;;  %v2616_v50 = vpack.c.bf16 %v346_v42, %v345_v41  ;;  %v2622_v52 = vpack.c.bf16 %v364_v47, %v363_v46  ;;  %s2685_s16 = scalar_lea.vmem %s3274_s0, %s1777_s27  ;;  %s2297_s24 = scalar_lea.vmem %s3226_s21, 1024 }
  0x19   : > { %v2620_v51 = vpack.c.bf16 %v378_v45, %v377_v44  ;;  %v347_v53 = vld [vmem:[%s3276_s2 + $0x40] sm:$0xff]  ;;  %v348_v54 = vld [vmem:[%s3276_s2 + $0x48] sm:$0xff]  ;;  %v2634_v56 = vpack.c.bf16 %v396_v49, %v395_v48  ;;  %v365_v58 = vld [vmem:[%s3276_s2 + $0xd0] sm:$0xff]  ;;  %p2298_p11 = scmp.ne.s32.totalorder %s3226_s21, %s2297_s24  ;;  %s2301_s27 = sshll.u32 %s2362_s25, 4  ;;  %s2302_s27 = int_to_ptr.vmem [resolvable:$false] %s2301_s27 }
  0x1a   : > { %2018 = vmatpush3.bf16.msra.mxu0 %v2563_v34  ;;  %v379_v55 = vld [vmem:[%s3276_s2 + $0x140] sm:$0xff]  ;;  %v380_v57 = vld [vmem:[%s3276_s2 + $0x148] sm:$0xff]  ;;  %v366_v59 = vld [vmem:[%s3276_s2 + $0xd8] sm:$0xff]  ;;  %v2653_v62 = vpack.c.bf16 %v348_v54, %v347_v53  ;;  %s2303_s26 = scalar_lea.vmem %s2302_s27, 2048  ;;  %p2304_p0 = scmp.lt.s32.totalorder %s3226_s21, %s2302_s27 }
  0x1b   : > { %2050 = vmatpush3.bf16.msra.mxu1 %v2576_v38  ;;  %2020 = vmatprep.subr.bf16.mxu0 %v2578_v39  ;;  %v397_v60 = vld [vmem:[%s3276_s2 + $0x1d0] sm:$0xff]  ;;  %v398_v61 = vld [vmem:[%s3276_s2 + $0x1d8] sm:$0xff]  ;;  %v2657_v63 = vpack.c.bf16 %v380_v57, %v379_v55  ;;  %v2659_v0 = vpack.c.bf16 %v366_v59, %v365_v58  ;;  %v367_v9 = vld [vmem:[%s3276_s2 + $0xe0] sm:$0xff]  ;;  %p2299_p12 = pnand %p2298_p11, %p2453_p5  ;;  %p2305_p1 = scmp.lt.s32.totalorder %s2303_s26, %s2297_s24 }
  0x1c   : > { %2052 = vmatprep.subr.bf16.mxu1 %v2590_v43  ;;  %v349_v1 = vld [vmem:[%s3276_s2 + $0x50] sm:$0xff]  ;;  %v350_v2 = vld [vmem:[%s3276_s2 + $0x58] sm:$0xff]  ;;  %v2671_v5 = vpack.c.bf16 %v398_v61, %v397_v60  ;;  %v368_v10 = vld [vmem:[%s3276_s2 + $0xe8] sm:$0xff] }
  0x1d   : > { %v381_v4 = vld [vmem:[%s3276_s2 + $0x150] sm:$0xff]  ;;  %v382_v6 = vld [vmem:[%s3276_s2 + $0x158] sm:$0xff]  ;;  %v399_v11 = vld [vmem:[%s3276_s2 + $0x1e0] sm:$0xff]  ;;  %v2694_v14 = vpack.c.bf16 %v350_v2, %v349_v1  ;;  %v2706_v20 = vpack.c.bf16 %v368_v10, %v367_v9  ;;  %p2300_p13 = pneg %p2299_p12  ;;  %p2306_p2 = por %p2305_p1, %p2304_p0 }
  0x1e   : > { %2022 = vmatpush3.bf16.msra.mxu0 %v2616_v50  ;;  %v400_v13 = vld [vmem:[%s3276_s2 + $0x1e8] sm:$0xff]  ;;  %v351_v15 = vld [vmem:[%s3276_s2 + $0x60] sm:$0xff]  ;;  %v2704_v19 = vpack.c.bf16 %v382_v6, %v381_v4  ;;  %v2715_v24 = vld [vmem:[%s2685_s16 + $0x18] sm:$0xff] }
  0x1f   : > { %2054 = vmatpush3.bf16.msra.mxu1 %v2620_v51  ;;  %2024 = vmatprep.subr.bf16.mxu0 %v2622_v52  ;;  %v352_v18 = vld [vmem:[%s3276_s2 + $0x68] sm:$0xff]  ;;  %v383_v22 = vld [vmem:[%s3276_s2 + $0x160] sm:$0xff]  ;;  %v2718_v27 = vpack.c.bf16 %v400_v13, %v399_v11  ;;  %v369_v29 = vld [vmem:[%s3276_s2 + $0xf0] sm:$0xff]  ;;  %p2307_p3 = pnand %p2306_p2, %p2300_p13 }
  0x20   : > { %2056 = vmatprep.subr.bf16.mxu1 %v2634_v56  ;;  %v2712_v23 = vld [vmem:[%s2685_s16 + $0x8] sm:$0xff]  ;;  %v370_v31 = vld [vmem:[%s3276_s2 + $0xf8] sm:$0xff]  ;;  %v401_v32 = vld [vmem:[%s3276_s2 + $0x1f0] sm:$0xff]  ;;  %542 = vmatprep.mubr.f32.mxu1 %v2715_v24  ;;  %v2738_v35 = vpack.c.bf16 %v352_v18, %v351_v15 }
  0x21   : > { %v384_v28 = vld [vmem:[%s3276_s2 + $0x168] sm:$0xff]  ;;  %467 = vmatprep.mubr.f32.mxu0 %v2712_v23  ;;  %v402_v33 = vld [vmem:[%s3276_s2 + $0x1f8] sm:$0xff]  ;;  %v2744_v37 = vpack.c.bf16 %v370_v31, %v369_v29  ;;  %v353_v40 = vld [vmem:[%s3276_s2 + $0x70] sm:$0xff] }
  0x22   : > { %2026 = vmatpush3.bf16.msra.mxu0 %v2653_v62  ;;  %v2742_v36 = vpack.c.bf16 %v384_v28, %v383_v22  ;;  %v354_v41 = vld [vmem:[%s3276_s2 + $0x78] sm:$0xff]  ;;  %v2753_v42 = vpack.c.bf16 %v402_v33, %v401_v32  ;;  %v385_v44 = vld [vmem:[%s3276_s2 + $0x170] sm:$0xff]  ;;  %v2771_v48 = vld [vmem:[%s2685_s16] sm:$0xff] }
  0x23   : > { %2058 = vmatpush3.bf16.msra.mxu1 %v2657_v63  ;;  %2028 = vmatprep.subr.bf16.mxu0 %v2659_v0  ;;  %v386_v45 = vld [vmem:[%s3276_s2 + $0x178] sm:$0xff]  ;;  %v2762_v46 = vpack.c.bf16 %v354_v41, %v353_v40  ;;  %v2775_v49 = vld [vmem:[%s2685_s16 + $0x10] sm:$0xff]  ;;  %v2778_v53 = vld [vmem:[%s2685_s16 + $0x28] sm:$0xff] }
  0x24   : > { %2060 = vmatprep.subr.bf16.mxu1 %v2671_v5  ;;  %v2766_v47 = vpack.c.bf16 %v386_v45, %v385_v44  ;;  %v2781_v54 = vld [vmem:[%s2685_s16 + $0x38] sm:$0xff]  ;;  %v2787_v55 = vld [vmem:[%s2685_s16 + $0x20] sm:$0xff]  ;;  %v2791_v57 = vld [vmem:[%s2685_s16 + $0x30] sm:$0xff] }
  0x25   : > { %v556_v58 = vld [vmem:[%s3277_s3 + $0x8] sm:$0xff]  ;;  %v558_v60 = vld [vmem:[%s3277_s3 + $0x18] sm:$0xff]  ;;  %v555_v2 = vld [vmem:[%s3277_s3] sm:$0xff] }
  0x26   : > { %2030 = vmatpush3.bf16.msra.mxu0 %v2694_v14  ;;  %v560_v59 = vld [vmem:[%s3277_s3 + $0x28] sm:$0xff]  ;;  %v562_v1 = vld [vmem:[%s3277_s3 + $0x38] sm:$0xff]  ;;  %v559_v4 = vld [vmem:[%s3277_s3 + $0x20] sm:$0xff] }
  0x27   : > { %2062 = vmatpush3.bf16.msra.mxu1 %v2704_v19  ;;  %2032 = vmatprep.subr.bf16.mxu0 %v2706_v20  ;;  %v2071_v61 = vpack.c.bf16 %v560_v59, %v556_v58  ;;  %v2079_v6 = vpack.c.bf16 %v562_v1, %v558_v60  ;;  %v2073_v9 = vpack.c.bf16 %v559_v4, %v555_v2  ;;  %v557_v10 = vld [vmem:[%s3277_s3 + $0x10] sm:$0xff]  ;;  %v564_v15 = vld [vmem:[%s3277_s3 + $0x48] sm:$0xff]  ;;  %v566_v22 = vld [vmem:[%s3277_s3 + $0x58] sm:$0xff]  ;;  %v2361_v58 = vmov 0.0  }
  0x28   : > { %2064 = vmatprep.subr.bf16.mxu1 %v2718_v27  ;;  %v561_v11 = vld [vmem:[%s3277_s3 + $0x30] sm:$0xff]  ;;  %v568_v18 = vld [vmem:[%s3277_s3 + $0x68] sm:$0xff]  ;;  %v570_v29 = vld [vmem:[%s3277_s3 + $0x78] sm:$0xff] }
  0x29   : > { %v2081_v13 = vpack.c.bf16 %v561_v11, %v557_v10  ;;  %v2075_v28 = vpack.c.bf16 %v568_v18, %v564_v15  ;;  %v563_v31 = vld [vmem:[%s3277_s3 + $0x40] sm:$0xff]  ;;  %v2083_v33 = vpack.c.bf16 %v570_v29, %v566_v22  ;;  %v565_v41 = vld [vmem:[%s3277_s3 + $0x50] sm:$0xff]  ;;  %v757_v60 = vld [vmem:[%s3278_s4 + $0x88] sm:$0xff] }
  0x2a   : > { %2034 = vmatpush3.bf16.msra.mxu0 %v2738_v35  ;;  %v567_v32 = vld [vmem:[%s3277_s3 + $0x60] sm:$0xff]  ;;  %v569_v44 = vld [vmem:[%s3277_s3 + $0x70] sm:$0xff]  ;;  %v789_v2 = vld [vmem:[%s3278_s4 + $0x188] sm:$0xff] }
  0x2b   : > { %2066 = vmatpush3.bf16.msra.mxu1 %v2742_v36  ;;  %2036 = vmatprep.subr.bf16.mxu0 %v2744_v37  ;;  %v2077_v40 = vpack.c.bf16 %v567_v32, %v563_v31  ;;  %v2085_v45 = vpack.c.bf16 %v569_v44, %v565_v41  ;;  %v756_v59 = vld [vmem:[%s3278_s4 + $0x80] sm:$0xff]  ;;  %v741_v22 = vld [vmem:[%s3278_s4 + $0x8] sm:$0xff]  ;;  %v758_v32 = vld [vmem:[%s3278_s4 + $0x90] sm:$0xff] }
  0x2c   : > { %2068 = vmatprep.subr.bf16.mxu1 %v2753_v42  ;;  %v2087_v1 = vpack.c.bf16 %v757_v60, %v756_v59  ;;  %v740_v18 = vld [vmem:[%s3278_s4] sm:$0xff]  ;;  %v773_v31 = vld [vmem:[%s3278_s4 + $0x108] sm:$0xff]  ;;  %v759_v44 = vld [vmem:[%s3278_s4 + $0x98] sm:$0xff] }
  0x2d   : > { %v772_v29 = vld [vmem:[%s3278_s4 + $0x100] sm:$0xff]  ;;  %v791_v59 = vld [vmem:[%s3278_s4 + $0x198] sm:$0xff] }
  0x2e   : > { %2038 = vmatpush3.bf16.msra.mxu0 %v2762_v46 }
  0x2f   : > { %2070 = vmatpush3.bf16.msra.mxu1 %v2766_v47  ;;  %2072 = vmatprep.subr.bf16.mxu0 %v2071_v61  ;;  %v788_v61 = vld [vmem:[%s3278_s4 + $0x180] sm:$0xff] }
  0x30   : > { %2080 = vmatprep.subr.bf16.mxu1 %v2079_v6  ;;  %v2119_v4 = vpack.c.bf16 %v789_v2, %v788_v61 }
  0x31   : > { %468 = vmatmul.mubr.f32.vlgmr.msra.gmra.mrb[0].mxu0 %v2771_v48 }
  0x32   : > { %543 = vmatmul.mubr.f32.vlgmr.msra.gmra.mrb[0].mxu1 %v2775_v49  ;;  %472 = vmatprep.mubr.f32.mxu0 %v2778_v53 }
  0x33   : > { %547 = vmatprep.mubr.f32.mxu1 %v2781_v54  ;;  %2074 = vmatpush1.bf16.msra.mxu0 %v2073_v9 }
  0x34   : > { %2082 = vmatpush1.bf16.msra.mxu1 %v2081_v13  ;;  %2076 = vmatprep.subr.bf16.mxu0 %v2075_v28 }
  0x35   : > { %473 = vmatmul.mubr.f32.gmra.mrb[2].mxu0 %v2787_v55  ;;  %2084 = vmatprep.subr.bf16.mxu1 %v2083_v33 }
  0x36   : > { %548 = vmatmul.mubr.f32.gmra.mrb[2].mxu1 %v2791_v57  ;;  %642 = vmatprep.mubr.f32.mxu0 %v2361_v58 }
  0x37   : > { %2078 = vmatpush1.bf16.msra.mxu0 %v2077_v40  ;;  %719 = vmatprep.mubr.f32.mxu1 %v2361_v58 }
  0x38   : > { %2086 = vmatpush1.bf16.msra.mxu1 %v2085_v45  ;;  %2088 = vmatprep.subr.bf16.mxu0 %v2087_v1  ;;  %v790_v45 = vld [vmem:[%s3278_s4 + $0x190] sm:$0xff] }
  0x39   : > { %2120 = vmatprep.subr.bf16.mxu1 %v2119_v4  ;;  %v2089_v4 = vpack.c.bf16 %v741_v22, %v740_v18  ;;  %v760_v18 = vld [vmem:[%s3278_s4 + $0xa0] sm:$0xff] }
 0x104   : > { %v1811_v6 = vpop.f32.mrb[0].mxu0 }
 0x105   : > { %v1849_v9 = vpop.f32.mrb[0].mxu1  ;;  %v1812_v10 = vpop.f32.mrb[1].mxu0 }
 0x106   : > { %v1813_v11 = vadd.f32 %v1812_v10, %v1811_v6  ;;  %v1850_v13 = vpop.f32.mrb[1].mxu1  ;;  %v2121_v6 = vpack.c.bf16 %v773_v31, %v772_v29  ;;  %v743_v10 = vld [vmem:[%s3278_s4 + $0x18] sm:$0xff]  ;;  %v761_v29 = vld [vmem:[%s3278_s4 + $0xa8] sm:$0xff]  ;;  %v792_v31 = vld [vmem:[%s3278_s4 + $0x1a0] sm:$0xff] }
 0x107   : > { %v1851_v15 = vadd.f32 %v1850_v13, %v1849_v9  ;;  %v742_v9 = vld [vmem:[%s3278_s4 + $0x10] sm:$0xff]  ;;  %v2123_v13 = vpack.c.bf16 %v791_v59, %v790_v45  ;;  %v745_v45 = vld [vmem:[%s3278_s4 + $0x28] sm:$0xff]  ;;  %v2095_v59 = vpack.c.bf16 %v761_v29, %v760_v18  ;;  %v779_v29 = vld [vmem:[%s3278_s4 + $0x138] sm:$0xff] }
 0x108   : > { %v1814_v28 = vpop.f32.mrb[2].mxu0 }
 0x109   : > { %v545_v33 = vadd.f32 %v1851_v15, %v1813_v11  ;;  %v1852_v40 = vpop.f32.mrb[2].mxu1  ;;  %v1815_v41 = vpop.f32.mrb[3].mxu0  ;;  %v2091_v11 = vpack.c.bf16 %v759_v44, %v758_v32  ;;  %v774_v15 = vld [vmem:[%s3278_s4 + $0x110] sm:$0xff]  ;;  %v793_v32 = vld [vmem:[%s3278_s4 + $0x1a8] sm:$0xff]  ;;  %v744_v44 = vld [vmem:[%s3278_s4 + $0x20] sm:$0xff] }
 0x10a   : > { %v1816_v60 = vadd.f32 %v1815_v41, %v1814_v28  ;;  %v1853_v61 = vpop.f32.mrb[3].mxu1  ;;  %v775_v28 = vld [vmem:[%s3278_s4 + $0x118] sm:$0xff] }
 0x10b   : > { %v553_v1 = vmul.f32 0.011048543, %v545_v33  ;;  %v1854_v2 = vadd.f32 %v1853_v61, %v1852_v40  ;;  %v2093_v40 = vpack.c.bf16 %v743_v10, %v742_v9  ;;  %v2125_v41 = vpack.c.bf16 %v775_v28, %v774_v15  ;;  %v776_v61 = vld [vmem:[%s3278_s4 + $0x120] sm:$0xff]  ;;  %v795_v9 = vld [vmem:[%s3278_s4 + $0x1b8] sm:$0xff] }
 0x10c   : > { %v2097_v10 = vpack.c.bf16 %v745_v45, %v744_v44  ;;  %v747_v15 = vld [vmem:[%s3278_s4 + $0x38] sm:$0xff]  ;;  %v748_v45 = vld [vmem:[%s3278_s4 + $0x40] sm:$0xff] }
 0x10d   : > { %v550_v22 = vadd.f32 %v1854_v2, %v1816_v60  ;;  %1755 = vmatmul.mubr.msk.f32.vlgmr.msra.gmra.mrb[4].mxu0 %vm571_vm0, %v553_v1  ;;  %1757 = vmatmul.mubr.msk.f32.vlgmr.msra.gmra.mrb[4].mxu1 %vm571_vm0, %v553_v1  ;;  %v2127_v60 = vpack.c.bf16 %v793_v32, %v792_v31  ;;  %v777_v1 = vld [vmem:[%s3278_s4 + $0x128] sm:$0xff]  ;;  %v762_v2 = vld [vmem:[%s3278_s4 + $0xb0] sm:$0xff]  ;;  %v764_v31 = vld [vmem:[%s3278_s4 + $0xc0] sm:$0xff] }
 0x10e   : > { %648 = vmatprep.mubr.f32.mxu0 %v2361_v58  ;;  %725 = vmatprep.mubr.f32.mxu1 %v2361_v58  ;;  %v765_v32 = vld [vmem:[%s3278_s4 + $0xc8] sm:$0xff] }
 0x10f   : > { %v554_v33 = vmul.f32 0.011048543, %v550_v22  ;;  %2090 = vmatpush3.bf16.msra.mxu0 %v2089_v4  ;;  %2122 = vmatpush3.bf16.msra.mxu1 %v2121_v6  ;;  %v763_v4 = vld [vmem:[%s3278_s4 + $0xb8] sm:$0xff]  ;;  %v794_v6 = vld [vmem:[%s3278_s4 + $0x1b0] sm:$0xff] }
 0x110   : > { %2092 = vmatprep.subr.bf16.mxu0 %v2091_v11  ;;  %2124 = vmatprep.subr.bf16.mxu1 %v2123_v13  ;;  %v2129_v11 = vpack.c.bf16 %v777_v1, %v776_v61  ;;  %v746_v13 = vld [vmem:[%s3278_s4 + $0x30] sm:$0xff]  ;;  %v2099_v28 = vpack.c.bf16 %v763_v4, %v762_v2  ;;  %v2131_v18 = vpack.c.bf16 %v795_v9, %v794_v6  ;;  %v780_v1 = vld [vmem:[%s3278_s4 + $0x140] sm:$0xff]  ;;  %v781_v2 = vld [vmem:[%s3278_s4 + $0x148] sm:$0xff] }
 0x111   : > { %1756 = vmatmul.mubr.msk.f32.gmra.mrb[6].mxu0 %vm571_vm0, %v554_v33  ;;  %1758 = vmatmul.mubr.msk.f32.gmra.mrb[6].mxu1 %vm571_vm0, %v554_v33  ;;  %v778_v22 = vld [vmem:[%s3278_s4 + $0x130] sm:$0xff]  ;;  %v796_v33 = vld [vmem:[%s3278_s4 + $0x1c0] sm:$0xff]  ;;  %v767_v6 = vld [vmem:[%s3278_s4 + $0xd8] sm:$0xff] }
 0x112   : > { %v2133_v44 = vpack.c.bf16 %v779_v29, %v778_v22  ;;  %v766_v4 = vld [vmem:[%s3278_s4 + $0xd0] sm:$0xff] }
 0x113   : > { %2094 = vmatpush3.bf16.msra.mxu0 %v2093_v40  ;;  %2126 = vmatpush3.bf16.msra.mxu1 %v2125_v41  ;;  %v797_v40 = vld [vmem:[%s3278_s4 + $0x1c8] sm:$0xff]  ;;  %v2101_v41 = vpack.c.bf16 %v747_v15, %v746_v13  ;;  %v798_v9 = vld [vmem:[%s3278_s4 + $0x1d0] sm:$0xff]  ;;  %v2137_v13 = vpack.c.bf16 %v781_v2, %v780_v1  ;;  %v784_v2 = vld [vmem:[%s3278_s4 + $0x160] sm:$0xff] }
 0x114   : > { %2096 = vmatprep.subr.bf16.mxu0 %v2095_v59  ;;  %2128 = vmatprep.subr.bf16.mxu1 %v2127_v60  ;;  %v749_v59 = vld [vmem:[%s3278_s4 + $0x48] sm:$0xff]  ;;  %v2103_v60 = vpack.c.bf16 %v765_v32, %v764_v31  ;;  %v2135_v61 = vpack.c.bf16 %v797_v40, %v796_v33  ;;  %v750_v15 = vld [vmem:[%s3278_s4 + $0x50] sm:$0xff]  ;;  %v783_v31 = vld [vmem:[%s3278_s4 + $0x158] sm:$0xff] }
 0x115   : > { %v782_v29 = vld [vmem:[%s3278_s4 + $0x150] sm:$0xff]  ;;  %v768_v32 = vld [vmem:[%s3278_s4 + $0xe0] sm:$0xff]  ;;  %v769_v33 = vld [vmem:[%s3278_s4 + $0xe8] sm:$0xff] }
 0x116   : > { %v800_v40 = vld [vmem:[%s3278_s4 + $0x1e0] sm:$0xff]  ;;  %v753_v1 = vld [vmem:[%s3278_s4 + $0x68] sm:$0xff] }
 0x117   : > { %2098 = vmatpush3.bf16.msra.mxu0 %v2097_v10  ;;  %2130 = vmatpush3.bf16.msra.mxu1 %v2129_v11  ;;  %v799_v10 = vld [vmem:[%s3278_s4 + $0x1d8] sm:$0xff]  ;;  %v2105_v11 = vpack.c.bf16 %v749_v59, %v748_v45  ;;  %v2141_v45 = vpack.c.bf16 %v783_v31, %v782_v29  ;;  %v752_v59 = vld [vmem:[%s3278_s4 + $0x60] sm:$0xff] }
 0x118   : > { %2100 = vmatprep.subr.bf16.mxu0 %v2099_v28  ;;  %2132 = vmatprep.subr.bf16.mxu1 %v2131_v18  ;;  %v751_v28 = vld [vmem:[%s3278_s4 + $0x58] sm:$0xff]  ;;  %v2107_v18 = vpack.c.bf16 %v767_v6, %v766_v4  ;;  %v2139_v22 = vpack.c.bf16 %v799_v10, %v798_v9  ;;  %v785_v4 = vld [vmem:[%s3278_s4 + $0x168] sm:$0xff]  ;;  %v2113_v6 = vpack.c.bf16 %v753_v1, %v752_v59  ;;  %v770_v10 = vld [vmem:[%s3278_s4 + $0xf0] sm:$0xff] }
 0x119   : > { %v2145_v9 = vpack.c.bf16 %v785_v4, %v784_v2 }
 0x11b   : > { %2102 = vmatpush3.bf16.msra.mxu0 %v2101_v41  ;;  %2134 = vmatpush3.bf16.msra.mxu1 %v2133_v44  ;;  %v801_v41 = vld [vmem:[%s3278_s4 + $0x1e8] sm:$0xff]  ;;  %v2109_v44 = vpack.c.bf16 %v751_v28, %v750_v15  ;;  %v803_v28 = vld [vmem:[%s3278_s4 + $0x1f8] sm:$0xff] }
 0x11c   : > { %2104 = vmatprep.subr.bf16.mxu0 %v2103_v60  ;;  %2136 = vmatprep.subr.bf16.mxu1 %v2135_v61  ;;  %v2111_v60 = vpack.c.bf16 %v769_v33, %v768_v32  ;;  %v2143_v61 = vpack.c.bf16 %v801_v41, %v800_v40  ;;  %v786_v32 = vld [vmem:[%s3278_s4 + $0x170] sm:$0xff]  ;;  %v787_v33 = vld [vmem:[%s3278_s4 + $0x178] sm:$0xff] }
 0x11d   : > { %v2149_v40 = vpack.c.bf16 %v787_v33, %v786_v32 }
 0x11f   : > { %2106 = vmatpush3.bf16.msra.mxu0 %v2105_v11  ;;  %2138 = vmatpush3.bf16.msra.mxu1 %v2137_v13  ;;  %v771_v11 = vld [vmem:[%s3278_s4 + $0xf8] sm:$0xff]  ;;  %v802_v13 = vld [vmem:[%s3278_s4 + $0x1f0] sm:$0xff] }
 0x120   : > { %2108 = vmatprep.subr.bf16.mxu0 %v2107_v18  ;;  %2140 = vmatprep.subr.bf16.mxu1 %v2139_v22  ;;  %v2115_v15 = vpack.c.bf16 %v771_v11, %v770_v10  ;;  %v754_v18 = vld [vmem:[%s3278_s4 + $0x70] sm:$0xff]  ;;  %v755_v22 = vld [vmem:[%s3278_s4 + $0x78] sm:$0xff]  ;;  %v2147_v29 = vpack.c.bf16 %v803_v28, %v802_v13 }
 0x121   : > { %v2117_v31 = vpack.c.bf16 %v755_v22, %v754_v18 }
 0x123   : > { %2110 = vmatpush3.bf16.msra.mxu0 %v2109_v44  ;;  %2142 = vmatpush3.bf16.msra.mxu1 %v2141_v45 }
 0x124   : > { %2112 = vmatprep.subr.bf16.mxu0 %v2111_v60  ;;  %2144 = vmatprep.subr.bf16.mxu1 %v2143_v61 }
 0x127   : > { %2114 = vmatpush3.bf16.msra.mxu0 %v2113_v6  ;;  %2146 = vmatpush3.bf16.msra.mxu1 %v2145_v9 }
 0x128   : > { %2116 = vmatprep.subr.bf16.mxu0 %v2115_v15  ;;  %2148 = vmatprep.subr.bf16.mxu1 %v2147_v29  ;;  %v1759_v29 = vld [vmem:[%s3275_s1] ss:$0 sm:$0xff] }
 0x12b   : > { %2118 = vmatpush3.bf16.msra.mxu0 %v2117_v31  ;;  %2150 = vmatpush3.bf16.msra.mxu1 %v2149_v40 }
 0x1e0   : > { %v644_v41 = vpop.f32.mrb[4].mxu0  ;;  %v721_v44 = vpop.f32.mrb[4].mxu1 }
 0x1e1   : > { %v646_v45 = vpop.f32.mrb[5].mxu0  ;;  %v723_v59 = vpop.f32.mrb[5].mxu1  ;;  %v732_v1 = vmul.f32 %v644_v41, %v2771_v48  ;;  %v734_v2 = vmul.f32 %v721_v44, %v2775_v49 }
 0x1e2   : > { %v733_v60 = vmul.f32 %v646_v45, %v2712_v23  ;;  %v735_v61 = vmul.f32 %v723_v59, %v2715_v24 }
 0x1e4   : > { %v650_v4 = vpop.f32.mrb[6].mxu0  ;;  %v727_v6 = vpop.f32.mrb[6].mxu1  ;;  %875 = vmatprep.mubr.f32.mxu0 %v733_v60  ;;  %950 = vmatprep.mubr.f32.mxu1 %v735_v61 }
 0x1e5   : > { %v652_v9 = vpop.f32.mrb[7].mxu0  ;;  %v729_v10 = vpop.f32.mrb[7].mxu1  ;;  %876 = vmatmul.mubr.f32.vlgmr.msra.gmra.mrb[8].mxu0 %v732_v1  ;;  %951 = vmatmul.mubr.f32.vlgmr.msra.gmra.mrb[8].mxu1 %v734_v2  ;;  %v736_v15 = vmul.f32 %v650_v4, %v2787_v55  ;;  %v738_v28 = vmul.f32 %v727_v6, %v2791_v57 }
 0x1e6   : > { %v737_v11 = vmul.f32 %v652_v9, %v2778_v53  ;;  %v739_v13 = vmul.f32 %v729_v10, %v2781_v54 }
 0x1e8   : > { %880 = vmatprep.mubr.f32.mxu0 %v737_v11  ;;  %955 = vmatprep.mubr.f32.mxu1 %v739_v13 }
 0x1e9   : > { %881 = vmatmul.mubr.f32.gmra.mrb[10].mxu0 %v736_v15  ;;  %956 = vmatmul.mubr.f32.gmra.mrb[10].mxu1 %v738_v28 }
 0x1ea   : > { %1062 = vmatprep.mubr.f32.mxu0 %v2361_v58  ;;  %1139 = vmatprep.mubr.f32.mxu1 %v2361_v58 }
 0x2b8   : > { %v1887_v18 = vpop.f32.mrb[8].mxu0  ;;  %v1925_v22 = vpop.f32.mrb[8].mxu1 }
 0x2b9   : > { %v1888_v31 = vpop.f32.mrb[9].mxu0  ;;  %v1926_v32 = vpop.f32.mrb[9].mxu1 }
 0x2ba   : > { %v1889_v33 = vadd.f32 %v1888_v31, %v1887_v18  ;;  %v1927_v40 = vadd.f32 %v1926_v32, %v1925_v22 }
 0x2bc   : > { %v878_v41 = vadd.f32 %v1889_v33, %v1759_v29  ;;  %v1890_v44 = vpop.f32.mrb[10].mxu0  ;;  %v1928_v45 = vpop.f32.mrb[10].mxu1 }
 0x2bd   : > { %v1891_v59 = vpop.f32.mrb[11].mxu0  ;;  %v1929_v60 = vpop.f32.mrb[11].mxu1 }
 0x2be   : > { %v1892_v61 = vadd.f32 %v1891_v59, %v1890_v44  ;;  %v1930_v1 = vadd.f32 %v1929_v60, %v1928_v45  ;;  %v953_v2 = vadd.f32 %v1927_v40, %v878_v41  ;;  %v985_v40 = vld [vmem:[%s3279_s5 + $0x8] sm:$0xff]  ;;  %v987_v44 = vld [vmem:[%s3279_s5 + $0x18] sm:$0xff]  ;;  %v984_v60 = vld [vmem:[%s3279_s5] sm:$0xff] }
 0x2bf   : > { %v989_v41 = vld [vmem:[%s3279_s5 + $0x28] sm:$0xff]  ;;  %v991_v59 = vld [vmem:[%s3279_s5 + $0x38] sm:$0xff] }
 0x2c0   : > { %v883_v4 = vadd.f32 %v1892_v61, %v1759_v29  ;;  %v962_v6 = vsel %vm961_vm1, %v953_v2, -inf  ;;  %v2151_v45 = vpack.c.bf16 %v989_v41, %v985_v40  ;;  %v988_v61 = vld [vmem:[%s3279_s5 + $0x20] sm:$0xff] }
 0x2c1   : > { %963 = vmax.xlane.f32.xlu0 %v962_v6  ;;  %v990_v6 = vld [vmem:[%s3279_s5 + $0x30] sm:$0xff] }
 0x2c2   : > { %v958_v9 = vadd.f32 %v1930_v1, %v883_v4  ;;  %v2155_v1 = vpack.c.bf16 %v991_v59, %v987_v44  ;;  %v986_v4 = vld [vmem:[%s3279_s5 + $0x10] sm:$0xff]  ;;  %2152 = vmatprep.subr.bf16.mxu0 %v2151_v45 }
 0x2c4   : > { %v965_v10 = vsel %vm961_vm1, %v958_v9, -inf  ;;  %2156 = vmatprep.subr.bf16.mxu1 %v2155_v1 }
 0x2c5   : > { %966 = vmax.xlane.f32.xlu0 %v965_v10 }
 0x34e   : > { %v964_v11 = vpop.xlane.xlu0 %963 }
 0x34f   : > { %v968_v13 = vsub.f32 %v953_v2, %v964_v11  ;;  %v2153_v2 = vpack.c.bf16 %v988_v61, %v984_v60 }
 0x351   : > { %v970_v15 = vmul.f32 1.442695, %v968_v13  ;;  %2154 = vmatpush1.bf16.msra.mxu0 %v2153_v2 }
 0x352   : > { %v967_v28 = vpop.xlane.xlu0 %966  ;;  %2160 = vmatprep.subr.bf16.mxu0 %v2472_v3  ;;  %v1311_v3 = vld [vmem:[%s3280_s6 + $0x8] sm:$0xff] }
 0x353   : > { %2289 = vpow2.f32 %v970_v15  ;;  %v969_v18 = vsub.f32 %v958_v9, %v967_v28  ;;  %v2157_v9 = vpack.c.bf16 %v990_v6, %v986_v4 }
 0x355   : > { %v972_v22 = vmul.f32 1.442695, %v969_v18  ;;  %2158 = vmatpush1.bf16.msra.mxu1 %v2157_v9  ;;  %v1486_v9 = vld [vmem:[%s3281_s7] sm:$0xff] }
 0x356   : > { %2192 = vmatprep.subr.bf16.mxu1 %v2483_v7  ;;  %v1315_v7 = vld [vmem:[%s3280_s6 + $0x28] sm:$0xff] }
 0x357   : > { %2291 = vpow2.f32 %v972_v22 }
 0x35d   : > { %v2290_v31 = vpop.eup %2289 }
 0x35e   : > { %v974_v32 = vsel %vm961_vm1, %v2290_v31, 0.0 }
 0x35f   : > { %975 = vadd.xlane.f32.xlu1 %v974_v32 }
 0x361   : > { %v2292_v29 = vpop.eup %2291 }
 0x362   : > { %v977_v33 = vsel %vm961_vm1, %v2292_v29, 0.0 }
 0x363   : > { %978 = vadd.xlane.f32.xlu1 %v977_v33 }
 0x3ec   : > { %v976_v10 = vpop.xlane.xlu1 %975 }
 0x3ed   : > { %2293 = vrcp.f32 %v976_v10  ;;  %v1488_v10 = vld [vmem:[%s3281_s7 + $0x10] sm:$0xff] }
 0x3f0   : > { %v979_v11 = vpop.xlane.xlu1 %978 }
 0x3f1   : > { %2295 = vrcp.f32 %v979_v11 }
 0x3f7   : > { %v2294_v13 = vpop.eup %2293 }
 0x3f8   : > { %v981_v15 = vmul.f32 %v2294_v13, %v2290_v31 }
 0x3fa   : > { %1760 = vmatmul.mubr.msk.f32.vlgmr.msra.gmra.mrb[12].mxu0 %vm961_vm1, %v981_v15  ;;  %1762 = vmatmul.mubr.msk.f32.vlgmr.msra.gmra.mrb[12].mxu1 %vm961_vm1, %v981_v15  ;;  %v1487_v15 = vld [vmem:[%s3281_s7 + $0x8] sm:$0xff] }
 0x3fb   : > { %v2296_v28 = vpop.eup %2295  ;;  %1068 = vmatprep.mubr.f32.mxu0 %v2361_v58  ;;  %1145 = vmatprep.mubr.f32.mxu1 %v2361_v58 }
 0x3fc   : > { %v983_v18 = vmul.f32 %v2296_v28, %v2292_v29  ;;  %2162 = vmatpush3.bf16.msra.mxu0 %v2485_v8  ;;  %2194 = vmatpush3.bf16.msra.mxu1 %v2497_v12  ;;  %v1313_v8 = vld [vmem:[%s3280_s6 + $0x18] sm:$0xff]  ;;  %v2223_v12 = vpack.c.bf16 %v1315_v7, %v1311_v3  ;;  %v1490_v28 = vld [vmem:[%s3281_s7 + $0x20] sm:$0xff]  ;;  %v1491_v7 = vld [vmem:[%s3281_s7 + $0x28] sm:$0xff] }
 0x3fd   : > { %2164 = vmatprep.subr.bf16.mxu0 %v2510_v16  ;;  %2196 = vmatprep.subr.bf16.mxu1 %v2512_v17  ;;  %v1317_v16 = vld [vmem:[%s3280_s6 + $0x38] sm:$0xff] }
 0x3fe   : > { %1761 = vmatmul.mubr.msk.f32.gmra.mrb[14].mxu0 %vm961_vm1, %v983_v18  ;;  %1763 = vmatmul.mubr.msk.f32.gmra.mrb[14].mxu1 %vm961_vm1, %v983_v18  ;;  %v2231_v17 = vpack.c.bf16 %v1317_v16, %v1313_v8  ;;  %v1492_v18 = vld [vmem:[%s3281_s7 + $0x30] sm:$0xff]  ;;  %v1489_v3 = vld [vmem:[%s3281_s7 + $0x18] sm:$0xff] }
 0x3ff   : > { %v1493_v8 = vld [vmem:[%s3281_s7 + $0x38] sm:$0xff] }
 0x400   : > { %2166 = vmatpush3.bf16.msra.mxu0 %v2524_v21  ;;  %2198 = vmatpush3.bf16.msra.mxu1 %v2537_v25  ;;  %v1310_v21 = vld [vmem:[%s3280_s6] sm:$0xff] }
 0x401   : > { %2168 = vmatprep.subr.bf16.mxu0 %v2539_v26  ;;  %2200 = vmatprep.subr.bf16.mxu1 %v2550_v30  ;;  %v1314_v25 = vld [vmem:[%s3280_s6 + $0x20] sm:$0xff]  ;;  %v1312_v26 = vld [vmem:[%s3280_s6 + $0x10] sm:$0xff] }
 0x402   : > { %v1316_v30 = vld [vmem:[%s3280_s6 + $0x30] sm:$0xff] }
 0x404   : > { %2170 = vmatpush3.bf16.msra.mxu0 %v2563_v34  ;;  %2202 = vmatpush3.bf16.msra.mxu1 %v2576_v38 }
 0x405   : > { %2172 = vmatprep.subr.bf16.mxu0 %v2578_v39  ;;  %2204 = vmatprep.subr.bf16.mxu1 %v2590_v43 }
 0x408   : > { %2174 = vmatpush3.bf16.msra.mxu0 %v2616_v50  ;;  %2206 = vmatpush3.bf16.msra.mxu1 %v2620_v51 }
 0x409   : > { %2176 = vmatprep.subr.bf16.mxu0 %v2622_v52  ;;  %2208 = vmatprep.subr.bf16.mxu1 %v2634_v56  ;;  %v2225_v52 = vpack.c.bf16 %v1314_v25, %v1310_v21  ;;  %v2233_v56 = vpack.c.bf16 %v1316_v30, %v1312_v26 }
 0x40c   : > { %2178 = vmatpush3.bf16.msra.mxu0 %v2653_v62  ;;  %2210 = vmatpush3.bf16.msra.mxu1 %v2657_v63 }
 0x40d   : > { %2180 = vmatprep.subr.bf16.mxu0 %v2659_v0  ;;  %2212 = vmatprep.subr.bf16.mxu1 %v2671_v5 }
 0x410   : > { %2182 = vmatpush3.bf16.msra.mxu0 %v2694_v14  ;;  %2214 = vmatpush3.bf16.msra.mxu1 %v2704_v19 }
 0x411   : > { %2184 = vmatprep.subr.bf16.mxu0 %v2706_v20  ;;  %2216 = vmatprep.subr.bf16.mxu1 %v2718_v27 }
 0x414   : > { %2186 = vmatpush3.bf16.msra.mxu0 %v2738_v35  ;;  %2218 = vmatpush3.bf16.msra.mxu1 %v2742_v36  ;;  %v1319_v35 = vld [vmem:[%s3280_s6 + $0x48] sm:$0xff] }
 0x415   : > { %2188 = vmatprep.subr.bf16.mxu0 %v2744_v37  ;;  %2220 = vmatprep.subr.bf16.mxu1 %v2753_v42  ;;  %v1323_v36 = vld [vmem:[%s3280_s6 + $0x68] sm:$0xff]  ;;  %v1321_v37 = vld [vmem:[%s3280_s6 + $0x58] sm:$0xff] }
 0x416   : > { %v2227_v42 = vpack.c.bf16 %v1323_v36, %v1319_v35 }
 0x418   : > { %2190 = vmatpush3.bf16.msra.mxu0 %v2762_v46  ;;  %2222 = vmatpush3.bf16.msra.mxu1 %v2766_v47  ;;  %v1325_v46 = vld [vmem:[%s3280_s6 + $0x78] sm:$0xff]  ;;  %v1318_v47 = vld [vmem:[%s3280_s6 + $0x40] sm:$0xff] }
 0x419   : > { %2224 = vmatprep.subr.bf16.mxu0 %v2223_v12  ;;  %2232 = vmatprep.subr.bf16.mxu1 %v2231_v17 }
 0x4cd   : > { %v1064_v34 = vpop.f32.mrb[12].mxu0  ;;  %v1141_v38 = vpop.f32.mrb[12].mxu1 }
 0x4ce   : > { %v1066_v39 = vpop.f32.mrb[13].mxu0  ;;  %v1143_v43 = vpop.f32.mrb[13].mxu1  ;;  %v1152_v62 = vmul.f32 %v1064_v34, %v2771_v48  ;;  %v1154_v63 = vmul.f32 %v1141_v38, %v2775_v49  ;;  %v1322_v48 = vld [vmem:[%s3280_s6 + $0x60] sm:$0xff]  ;;  %v2235_v49 = vpack.c.bf16 %v1325_v46, %v1321_v37 }
 0x4cf   : > { %v1153_v50 = vmul.f32 %v1066_v39, %v2712_v23  ;;  %v1155_v51 = vmul.f32 %v1143_v43, %v2715_v24 }
 0x4d1   : > { %v1070_v0 = vpop.f32.mrb[14].mxu0  ;;  %v1147_v5 = vpop.f32.mrb[14].mxu1  ;;  %1224 = vmatprep.mubr.f32.mxu0 %v1153_v50  ;;  %1299 = vmatprep.mubr.f32.mxu1 %v1155_v51 }
 0x4d2   : > { %v1072_v14 = vpop.f32.mrb[15].mxu0  ;;  %v1149_v19 = vpop.f32.mrb[15].mxu1  ;;  %1225 = vmatmul.mubr.f32.vlgmr.msra.gmra.mrb[16].mxu0 %v1152_v62  ;;  %1300 = vmatmul.mubr.f32.vlgmr.msra.gmra.mrb[16].mxu1 %v1154_v63  ;;  %v1156_v24 = vmul.f32 %v1070_v0, %v2787_v55  ;;  %v1158_v27 = vmul.f32 %v1147_v5, %v2791_v57  ;;  %v1324_v55 = vld [vmem:[%s3280_s6 + $0x70] sm:$0xff]  ;;  %v1502_v63 = vld [vmem:[%s3282_s8] sm:$0xff]  ;;  %v1503_v0 = vld [vmem:[%s3282_s8 + $0x8] sm:$0xff] }
 0x4d3   : > { %v1157_v20 = vmul.f32 %v1072_v14, %v2778_v53  ;;  %v1159_v23 = vmul.f32 %v1149_v19, %v2781_v54  ;;  %2226 = vmatpush1.bf16.msra.mxu0 %v2225_v52  ;;  %2234 = vmatpush1.bf16.msra.mxu1 %v2233_v56  ;;  %v2229_v53 = vpack.c.bf16 %v1322_v48, %v1318_v47  ;;  %v1320_v54 = vld [vmem:[%s3280_s6 + $0x50] sm:$0xff] }
 0x4d4   : > { %2228 = vmatprep.subr.bf16.mxu0 %v2227_v42  ;;  %v2237_v57 = vpack.c.bf16 %v1324_v55, %v1320_v54  ;;  %2236 = vmatprep.subr.bf16.mxu1 %v2235_v49 }
 0x4d5   : > { %1229 = vmatprep.mubr.f32.mxu0 %v1157_v20  ;;  %1304 = vmatprep.mubr.f32.mxu1 %v1159_v23 }
 0x4d6   : > { %1230 = vmatmul.mubr.f32.gmra.mrb[18].mxu0 %v1156_v24  ;;  %1305 = vmatmul.mubr.f32.gmra.mrb[18].mxu1 %v1158_v27 }
 0x4d7   : > { %1396 = vmatprep.mubr.f32.mxu0 %v2361_v58  ;;  %1473 = vmatprep.mubr.f32.mxu1 %v2361_v58 }
 0x4d8   : > { %2230 = vmatpush1.bf16.msra.mxu0 %v2229_v53  ;;  %2238 = vmatpush1.bf16.msra.mxu1 %v2237_v57 }
 0x5a5   : > { %v1963_v22 = vpop.f32.mrb[16].mxu0  ;;  %v2001_v31 = vpop.f32.mrb[16].mxu1 }
 0x5a6   : > { %v1964_v32 = vpop.f32.mrb[17].mxu0  ;;  %v2002_v29 = vpop.f32.mrb[17].mxu1 }
 0x5a7   : > { %v1965_v33 = vadd.f32 %v1964_v32, %v1963_v22  ;;  %v2003_v40 = vadd.f32 %v2002_v29, %v2001_v31 }
 0x5a9   : > { %v1302_v41 = vadd.f32 %v2003_v40, %v1965_v33  ;;  %v1966_v44 = vpop.f32.mrb[18].mxu0  ;;  %v2004_v45 = vpop.f32.mrb[18].mxu1 }
 0x5aa   : > { %v1967_v59 = vpop.f32.mrb[19].mxu0  ;;  %v2005_v60 = vpop.f32.mrb[19].mxu1 }
 0x5ab   : > { %v1968_v61 = vadd.f32 %v1967_v59, %v1966_v44  ;;  %v2006_v1 = vadd.f32 %v2005_v60, %v2004_v45  ;;  %1764 = vmatmul.mubr.msk.f32.vlgmr.msra.gmra.mrb[20].mxu0 %vm571_vm0, %v1302_v41  ;;  %1766 = vmatmul.mubr.msk.f32.vlgmr.msra.gmra.mrb[20].mxu1 %vm571_vm0, %v1302_v41 }
 0x5ac   : > { %1402 = vmatprep.mubr.f32.mxu0 %v2361_v58  ;;  %1479 = vmatprep.mubr.f32.mxu1 %v2361_v58 }
 0x5ad   : > { %v1307_v2 = vadd.f32 %v2006_v1, %v1968_v61 }
 0x5af   : > { %1765 = vmatmul.mubr.msk.f32.gmra.mrb[22].mxu0 %vm571_vm0, %v1307_v2  ;;  %1767 = vmatmul.mubr.msk.f32.gmra.mrb[22].mxu1 %vm571_vm0, %v1307_v2 }
 0x5b0   : > { %1574 = vmatprep.mubr.f32.mxu0 %v2361_v58  ;;  %1651 = vmatprep.mubr.f32.mxu1 %v2361_v58 }
 0x67e   : > { %v1398_v4 = vpop.f32.mrb[20].mxu0  ;;  %v1475_v6 = vpop.f32.mrb[20].mxu1 }
 0x67f   : > { %v1400_v11 = vpop.f32.mrb[21].mxu0  ;;  %v1477_v13 = vpop.f32.mrb[21].mxu1  ;;  %v1494_v17 = vmul.f32 %v1486_v9, %v1398_v4  ;;  %v1496_v21 = vmul.f32 %v1488_v10, %v1475_v6 }
 0x680   : > { %v1495_v38 = vmul.f32 %v1487_v15, %v1400_v11  ;;  %v1497_v39 = vmul.f32 %v1489_v3, %v1477_v13 }
 0x682   : > { %v1404_v12 = vpop.f32.mrb[22].mxu0  ;;  %v1481_v16 = vpop.f32.mrb[22].mxu1 }
 0x683   : > { %v1498_v25 = vmul.f32 %v1490_v28, %v1404_v12  ;;  %v1500_v26 = vmul.f32 %v1492_v18, %v1481_v16  ;;  %v1406_v30 = vpop.f32.mrb[23].mxu0  ;;  %v1483_v34 = vpop.f32.mrb[23].mxu1 }
 0x684   : > { %v1499_v43 = vmul.f32 %v1491_v7, %v1406_v30  ;;  %v1501_v50 = vmul.f32 %v1493_v8, %v1483_v34 }
 0x685   : > { %v2241_v51 = vpack.c.bf16 %v1498_v25, %v1494_v17  ;;  %v2245_v52 = vpack.c.bf16 %v1500_v26, %v1496_v21 }
 0x686   : > { %v2239_v56 = vpack.c.bf16 %v1499_v43, %v1495_v38  ;;  %v2243_v62 = vpack.c.bf16 %v1501_v50, %v1497_v39 }
 0x688   : > { %2240 = vmatprep.subr.bf16.mxu0 %v2239_v56  ;;  %2244 = vmatprep.subr.bf16.mxu1 %v2243_v62 }
 0x689   : > { %2242 = vmatpush1.bf16.msra.mxu0 %v2241_v51  ;;  %2246 = vmatpush1.bf16.msra.mxu1 %v2245_v52 }
 0x68c   : > { %1768 = vmatmul.mubr.msk.f32.vlgmr.msra.gmra.mrb[24].mxu0 %vm961_vm1, %v1502_v63  ;;  %1770 = vmatmul.mubr.msk.f32.vlgmr.msra.gmra.mrb[24].mxu1 %vm961_vm1, %v1502_v63 }
 0x68d   : > { %1580 = vmatprep.mubr.f32.mxu0 %v2361_v58  ;;  %1657 = vmatprep.mubr.f32.mxu1 %v2361_v58 }
 0x690   : > { %1769 = vmatmul.mubr.msk.f32.gmra.mrb[26].mxu0 %vm961_vm1, %v1503_v0  ;;  %1771 = vmatmul.mubr.msk.f32.gmra.mrb[26].mxu1 %vm961_vm1, %v1503_v0 }
 0x75f   : > { %v1576_v5 = vpop.f32.mrb[24].mxu0  ;;  %v1653_v14 = vpop.f32.mrb[24].mxu1 }
 0x760   : > { %1664 = vst [vmem:[%s325_s14] sm:$0xff] %v1576_v5  ;;  %1666 = vst [vmem:[%s325_s14 + $0x10] sm:$0xff] %v1653_v14  ;;  %v1578_v19 = vpop.f32.mrb[25].mxu0  ;;  %v1655_v20 = vpop.f32.mrb[25].mxu1 }
 0x761   : > { %1665 = vst [vmem:[%s325_s14 + $0x8] sm:$0xff] %v1578_v19  ;;  %1667 = vst [vmem:[%s325_s14 + $0x18] sm:$0xff] %v1655_v20 }
 0x763   : > { %v1582_v58 = vpop.f32.mrb[26].mxu0  ;;  %v1659_v23 = vpop.f32.mrb[26].mxu1 }
 0x764   : > { %1668 = vst [vmem:[%s325_s14 + $0x20] sm:$0xff] %v1582_v58  ;;  %1670 = vst [vmem:[%s325_s14 + $0x30] sm:$0xff] %v1659_v23  ;;  %v1584_v24 = vpop.f32.mrb[27].mxu0  ;;  %v1661_v27 = vpop.f32.mrb[27].mxu1 }
 0x765   : > { %1669 = vst [vmem:[%s325_s14 + $0x28] sm:$0xff] %v1584_v24  ;;  %1671 = vst [vmem:[%s325_s14 + $0x38] sm:$0xff] %v1661_v27 }
 0x766   : > { %2310 = shalt.err (!%p2307_p3)
}
 0x767   : > { %s2311_s28 = scalar_lea.hbm %s3231_s23, 1024  ;;  %s2315_s17 = scalar_lea.hbm %s3283_s9, 2048 }
 0x768   : > { %p2312_p4 = scmp.ne.s32.totalorder %s3231_s23, %s2311_s28  ;;  %p2316_p9 = scmp.lt.u32.totalorder %s3231_s23, %s3283_s9 }
 0x769   : > { %p2317_p10 = scmp.lt.u32.totalorder %s2315_s17, %s2311_s28  ;;  %p2319_p12 = scmp.lt.u32.totalorder %s2311_s28, %s3231_s23 }
 0x76a   : > { %p2313_p7 = pnand %p2312_p4, %p2453_p5 }
 0x76b   : > { %p2318_p11 = por %p2317_p10, %p2316_p9 }
 0x76c   : > { %p2314_p8 = pneg %p2313_p7 }
 0x76d   : > { %p2320_p13 = por %p2319_p12, %p2318_p11 }
 0x76f   : > { %p2321_p0 = pnand %p2320_p13, %p2314_p8 }
 0x771   : > { %2324 = shalt.err (!%p2321_p0)
}
 0x772   : > { %s2363_s24 = smov 512   ;;  %s2364_s25 = smov 32  }
 0x773   : > { %2247 = dma.vmem_to_hbm [thread:$0]  (%p2453_p5), %s3226_s21, 1024, %s3231_s23, %s3233_s13, %s2363_s24, %s2363_s24, %s2364_s25  }
 0x774 PF: > { %p2253_p1 = scmp.ge.s32.totalorder %s2359_s12, 2  ;;  %s1701_s27 = sand.u32 1, %s2347_s30  }
 0x775   : > { %s1702_s26 = scalar_lea.sflag [#allocation3], %s1701_s27 }
 0x776   : > { %p2250_p2 = pnand %p2253_p1, %p2457_p6 }
 0x778   : > { %2342 = dma.done.wait (!%p2250_p2), %s1702_s26, 1024  }
 0x779   : > { %2344 = vsyncadd (!%p2250_p2), %s1702_s26, 4294966272  ;;  %p19_p3 = scmp.ge.s32.totalorder %s2440_s15, 4   ;;  %s3286_s30 = smov %s2351_s10 }
 0x77a   : > { %s3287_s10 = smov %s2355_s11  ;;  %s3288_s11 = smov %s2451_s18 }
 0x77b   : > { %s3289_s12 = smov %s2440_s15  ;;  %21 = sbr.rel (!%p19_p3) target bundleno = 3 (0x3), region = 91 }
 0x782   :  { %1707 = vsyncpa [#allocation3], 1 }
 0x783   :  { %1709 = vsyncpa [#allocation3 + $0x1], 1 }

</bundles_post_ra>
